<compile_context>
chip_gen: v7x
topology: tpu7x:2x2x1
jax: 0.10.0
libtpu: 0.0.40
codegen_flags: <defaults>
</compile_context>

<pallas_src>
import functools

import jax
import jax.numpy as jnp
from jax.experimental import pallas as pl
from jax.experimental.pallas import tpu as pltpu

# ---------------- config (small synthetic shapes consistent with the module) ---------
BATCH = 2
SEQ = 16
VOCAB = 100
EMB_DIM = 32
MIDDEL_DIM = 64                              # mid_dim = middel_dim * 1
FEATURE_KERNEL = {1: 32, 2: 32}              # conv kernel size -> #filters (sums to 64)
W_DIM = 0.5
ATTN_DIM = int(W_DIM * MIDDEL_DIM)           # 32
HEAD_NUM = 4                                 # heads collapse: single-key softmax == 1
FFN_DIM = 128
SEMANTIC_NUM = 2
EMOTION_NUM = 2
STYLE_NUM = 2
DOMAIN_NUM = 3
LANGUAGE = "en"                              # -> emotion in = 38*5, style in = 32
EMOTION_IN = 38 * 5                          # 190
STYLE_IN = 32
MLP_DIMS = [int(0.8 * MIDDEL_DIM), MIDDEL_DIM]   # [51, 64]
NUM_EXPERTS = SEMANTIC_NUM + EMOTION_NUM + STYLE_NUM   # 6
LANE = 128
WIDE = 2 * LANE                              # 256-lane width of the packed slab
EMO_IN_PAD = ((EMOTION_IN + 7) // 8) * 8     # 190 -> 192 (sublane-aligned K dim)
HID_PAD = MIDDEL_DIM                         # MLP hidden 51 -> 64 (zero padded)

# ---------------- packed-slab row offsets (all multiples of 8) ------------------------
R_SEM = 0                                    # [64, 0:128]  semantic conv bank (prob-scaled)
R_W1 = R_SEM + 2 * EMB_DIM                   # [256, 0:256] merged emotion+style MLP layer 1
R_W2 = R_W1 + WIDE                           # [256, 0:256] merged MLP layer 2 (prob-scaled)
R_VO = R_W2 + WIDE                           # [64, 0:64]   wv @ wo (folded attention V*O)
R_F1 = R_VO + MIDDEL_DIM                     # [64, 0:128]  FFN layer 1
R_F2 = R_F1 + MIDDEL_DIM                     # [128, 0:64]  FFN layer 2
R_ADD = R_F2 + FFN_DIM                       # [B*L, 0:128] conv bias + (-1e30) tail mask
R_CONST = R_ADD + ((BATCH * SEQ + 7) // 8) * 8
SLAB_ROWS = R_CONST + 16                     # 16 const rows (biases / LN gamma+beta)


# ---------------- helpers -------------------------------------------------------------
def _layernorm(x, g, b, eps=1e-5):
    mu = jnp.mean(x, axis=-1, keepdims=True)
    var = jnp.mean((x - mu) ** 2, axis=-1, keepdims=True)
    return (x - mu) * jax.lax.rsqrt(var + eps) * g + b


def _halve(x):
    n = x.shape[-1] // 2
    return x[:, :n] + x[:, n:]


# ---------------- fused Pallas kernel: expert bank + mix + cross-attention ------------
def _generator_kernel(xt_ref, es_ref, dom_ref, w_ref, o_ref, *, batch, seq, mid):
    f32 = jnp.float32

    # ---- semantic experts: both conv banks (k=1,2) as ONE lane-packed dot ------------
    conv = jnp.dot(xt_ref[...], w_ref[R_SEM:R_SEM + 2 * EMB_DIM, :LANE],
                   preferred_element_type=f32)                      # [B*L, 128]
    # precomputed additive slab: prob-scaled bias on valid taps, -1e30 on the k=2 tail
    conv = conv + w_ref[R_ADD:R_ADD + batch * seq, :LANE]
    # max_pool1d over the full time axis, per batch (static, sublane-aligned slices)
    sem_pooled = jnp.concatenate(
        [jnp.max(conv[b * seq:(b + 1) * seq, :], axis=0, keepdims=True)
         for b in range(batch)], axis=0)                            # [B, 128]

    # ---- emotion + style experts: block-diagonal merged 2-layer MLP (256-wide) -------
    cb = w_ref[R_CONST:R_CONST + 16, :]                             # [16, 256] consts
    h1 = jnp.maximum(jnp.dot(es_ref[...], w_ref[R_W1:R_W1 + WIDE, :],
                             preferred_element_type=f32) + cb[0:1, :], 0.0)
    h2 = jnp.maximum(jnp.dot(h1, w_ref[R_W2:R_W2 + WIDE, :],
                             preferred_element_type=f32) + cb[1:2, :], 0.0)  # [B, 256]

    # ---- expert mixing: softmax(weight) probs were pre-folded into the weights -------
    t_feature = _halve(sem_pooled) + _halve(_halve(h2))             # [B, mid]

    # ---- cross-attention: single KV position -> softmax == 1 -> context == V ---------
    # wv @ wo and bv @ wo + bo are pre-multiplied at pack time (single dot here).
    attn = (jnp.dot(t_feature, w_ref[R_VO:R_VO + mid, :LANE],
                    preferred_element_type=f32) + cb[2:3, :LANE])[:, :mid]
    x1 = _layernorm(dom_ref[...] + attn, cb[3:4, :mid], cb[4:5, :mid])
    h = jnp.maximum(jnp.dot(x1, w_ref[R_F1:R_F1 + mid, :LANE],
                            preferred_element_type=f32) + cb[5:6, :LANE], 0.0)
    ffn = (jnp.dot(h, w_ref[R_F2:R_F2 + FFN_DIM, :LANE],
                   preferred_element_type=f32) + cb[6:7, :LANE])[:, :mid]
    o_ref[...] = _layernorm(x1 + ffn, cb[7:8, :mid], cb[8:9, :mid])


def _fused_forward(x_tap, es_in, dom, wslab):
    batch, mid = dom.shape
    seq = x_tap.shape[0] // batch
    assert batch * seq == BATCH * SEQ, "packed conv-addend rows assume BATCH*SEQ"

    kernel = functools.partial(_generator_kernel, batch=batch, seq=seq, mid=mid)
    args = (x_tap, es_in, dom, wslab)
    in_specs = [pl.BlockSpec(a.shape, lambda i: (0, 0)) for a in args]

    flops = 2 * (x_tap.shape[0] * x_tap.shape[1] * LANE      # semantic conv bank
                 + 2 * batch * WIDE * WIDE                   # merged MLP (2 dots)
                 + 2 * batch * mid * LANE                    # folded V*O + FFN1
                 + batch * FFN_DIM * LANE)                   # FFN2
    bytes_accessed = 4 * (x_tap.size + es_in.size + dom.size + wslab.size + batch * mid)
    cost = pl.CostEstimate(flops=flops, transcendentals=4 * batch,
                           bytes_accessed=bytes_accessed)

    return pl.pallas_call(
        kernel,
        grid=(1,),                                   # whole forward in one grid step
        in_specs=in_specs,
        out_specs=pl.BlockSpec((batch, mid), lambda i: (0, 0)),
        out_shape=jax.ShapeDtypeStruct((batch, mid), jnp.float32),
        compiler_params=pltpu.CompilerParams(dimension_semantics=("arbitrary",)),
        cost_estimate=cost,
    )(*args)


# ---------------- deterministic parameter init (synthetic "checkpoints") -------------
def _init_params(key):
    keys = iter(jax.random.split(key, 64))

    def nrm(shape, scale=0.05):
        return (scale * jax.random.normal(next(keys), shape)).astype(jnp.float32)

    params = {}
    params["emb_table"] = nrm((VOCAB, EMB_DIM), 0.1)      # stand-in for frozen BERT
    params["semantic"] = []
    for _ in range(SEMANTIC_NUM):
        convs = []
        for k, f in FEATURE_KERNEL.items():
            convs.append((nrm((k, EMB_DIM, f)), nrm((1, f))))
        params["semantic"].append(convs)

    def mlp_params(in_dim):
        layers = []
        d = in_dim
        for h in MLP_DIMS:
            layers.append((nrm((d, h)), nrm((1, h))))
            d = h
        return layers

    params["emotion"] = [mlp_params(EMOTION_IN) for _ in range(EMOTION_NUM)]
    params["style"] = [mlp_params(STYLE_IN) for _ in range(STYLE_NUM)]
    params["weight"] = nrm((1, NUM_EXPERTS), 1.0)          # torch.load(weight) stand-in
    params["buffer_pool"] = nrm((DOMAIN_NUM, MIDDEL_DIM), 0.5)  # buffer.pool stand-in
    params["xattn"] = {
        # wq/bq/wk/bk kept for module fidelity; with a single KV position the
        # attention weights are exactly 1.0, so they never affect the output.
        "wq": nrm((MIDDEL_DIM, ATTN_DIM)), "bq": nrm((1, ATTN_DIM)),
        "wk": nrm((MIDDEL_DIM, ATTN_DIM)), "bk": nrm((1, ATTN_DIM)),
        "wv": nrm((MIDDEL_DIM, ATTN_DIM)), "bv": nrm((1, ATTN_DIM)),
        "wo": nrm((ATTN_DIM, MIDDEL_DIM)), "bo": nrm((1, MIDDEL_DIM)),
        "g1": jnp.ones((1, MIDDEL_DIM), jnp.float32),
        "be1": jnp.zeros((1, MIDDEL_DIM), jnp.float32),
        "wf1": nrm((MIDDEL_DIM, FFN_DIM)), "bf1": nrm((1, FFN_DIM)),
        "wf2": nrm((FFN_DIM, MIDDEL_DIM)), "bf2": nrm((1, MIDDEL_DIM)),
        "g2": jnp.ones((1, MIDDEL_DIM), jnp.float32),
        "be2": jnp.zeros((1, MIDDEL_DIM), jnp.float32),
    }
    return params


# ---------------- one-time parameter packing (single lane-dense weight slab) ----------
def _pack_params(p, batch, seq):
    f32 = jnp.float32
    E, MID = EMB_DIM, MIDDEL_DIM
    # softmax(weight) is a frozen buffer; fold its probs into the expert weights
    # (ReLU and max-pool commute with non-negative scaling -> same math, fp-tolerance).
    probs = jax.nn.softmax(p["weight"], axis=-1)[0]        # [NUM_EXPERTS], order:
                                                           # [sem0, sem1, emo0, emo1, sty0, sty1]

    slab = jnp.zeros((SLAB_ROWS, WIDE), f32)

    # --- semantic conv bank: taps stacked along K, experts along lanes, prob-scaled ---
    w_sem = jnp.zeros((2 * E, SEMANTIC_NUM * MID), f32)
    b_sem = jnp.zeros((1, SEMANTIC_NUM * MID), f32)
    for e in range(SEMANTIC_NUM):
        col = e * MID
        for (w, b), (k, f) in zip(p["semantic"][e], FEATURE_KERNEL.items()):
            for dk in range(k):
                w_sem = w_sem.at[dk * E:(dk + 1) * E, col:col + f].set(w[dk] * probs[e])
            b_sem = b_sem.at[:, col:col + f].set(b * probs[e])
            col += f
    slab = slab.at[R_SEM:R_SEM + 2 * E, :SEMANTIC_NUM * MID].set(w_sem)

    # --- conv additive slab: prob-scaled bias for valid taps, -1e30 for k>1 tail taps --
    addend = jnp.tile(b_sem, (batch * seq, 1))             # [B*L, 128]
    t_idx = (jnp.arange(batch * seq) % seq)[:, None]
    for e in range(SEMANTIC_NUM):
        col = e * MID
        for k, f in FEATURE_KERNEL.items():
            if k > 1:
                colmask = jnp.zeros((1, SEMANTIC_NUM * MID), bool)
                colmask = colmask.at[:, col:col + f].set(True)
                addend = jnp.where((t_idx > seq - k) & colmask, -1e30, addend)
            col += f
    slab = slab.at[R_ADD:R_ADD + batch * seq, :SEMANTIC_NUM * MID].set(addend)

    # --- emotion + style MLP experts: block-diagonal merged layers (256 x 256) --------
    w1 = jnp.zeros((WIDE, WIDE), f32)
    b1 = jnp.zeros((1, WIDE), f32)
    w2 = jnp.zeros((WIDE, WIDE), f32)
    b2 = jnp.zeros((1, WIDE), f32)
    groups = [
        (p["emotion"], 0, EMOTION_IN, 0, probs[SEMANTIC_NUM:SEMANTIC_NUM + EMOTION_NUM]),
        (p["style"], EMO_IN_PAD, STYLE_IN, EMOTION_NUM * HID_PAD,
         probs[SEMANTIC_NUM + EMOTION_NUM:]),
    ]
    for plist, in_off, in_dim, hid_base, pr in groups:
        for e, ((wa, ba), (wb, bb)) in enumerate(plist):
            h = wa.shape[1]                                # 51 (padded to 64 lanes)
            off = hid_base + e * HID_PAD                   # hidden & output lane block
            w1 = w1.at[in_off:in_off + in_dim, off:off + h].set(wa)
            b1 = b1.at[:, off:off + h].set(ba)
            w2 = w2.at[off:off + h, off:off + MID].set(wb * pr[e])
            b2 = b2.at[:, off:off + MID].set(bb * pr[e])
    slab = slab.at[R_W1:R_W1 + WIDE, :].set(w1)
    slab = slab.at[R_W2:R_W2 + WIDE, :].set(w2)

    # --- cross-attention: fold V and O projections (single-KV softmax == 1) -----------
    xa = p["xattn"]
    wvo = xa["wv"] @ xa["wo"]                              # [64, 64]
    bvo = xa["bv"] @ xa["wo"] + xa["bo"]                   # [1, 64]
    slab = slab.at[R_VO:R_VO + MID, :MID].set(wvo)
    slab = slab.at[R_F1:R_F1 + MID, :FFN_DIM].set(xa["wf1"])
    slab = slab.at[R_F2:R_F2 + FFN_DIM, :MID].set(xa["wf2"])

    # --- const rows: MLP biases + attention biases + LayerNorm gamma/beta -------------
    C = R_CONST
    slab = slab.at[C + 0, :].set(b1[0])
    slab = slab.at[C + 1, :].set(b2[0])
    slab = slab.at[C + 2, :MID].set(bvo[0])
    slab = slab.at[C + 3, :MID].set(xa["g1"][0])
    slab = slab.at[C + 4, :MID].set(xa["be1"][0])
    slab = slab.at[C + 5, :FFN_DIM].set(xa["bf1"][0])
    slab = slab.at[C + 6, :MID].set(xa["bf2"][0])
    slab = slab.at[C + 7, :MID].set(xa["g2"][0])
    slab = slab.at[C + 8, :MID].set(xa["be2"][0])

    return {"emb_table": p["emb_table"], "buffer_pool": p["buffer_pool"], "wslab": slab}


# ---------------- Generator.forward ---------------------------------------------------
def generator_forward(packed, tag, **kwargs):
    content = kwargs["content"]
    masks = kwargs["content_masks"]
    style_feature = kwargs["style_feature"]
    # NOTE: content_global_attention_mask only selected which frozen-encoder call to
    # make in the reference; with the embedding stand-in both branches are identical,
    # so the host-syncing isnan()/bool() check was removed (forward stays jittable).
    _ = kwargs.get("content_global_attention_mask")

    emotion_feature = jnp.concatenate(
        [kwargs["content_emotion"], kwargs["comments_emotion"], kwargs["emotion_gap"]],
        axis=1)                                                       # [B, 190]

    # merged emotion+style input for the block-diagonal MLP (190 | pad | 32 | pad -> 256)
    es_in = jnp.zeros((emotion_feature.shape[0], WIDE), jnp.float32)
    es_in = es_in.at[:, :EMOTION_IN].set(emotion_feature)
    es_in = es_in.at[:, EMO_IN_PAD:EMO_IN_PAD + STYLE_IN].set(style_feature)

    # TODO(synk): frozen pretrained BERT/RoBERTa encoder replaced by embedding lookup.
    init_feature = packed["emb_table"][content] * masks[..., None]    # [B, L, E]

    # stack the conv taps along the feature axis so the in-kernel conv is a single
    # aligned matmul (no sublane-misaligned shifted loads inside the kernel).
    b_, l_, e_ = init_feature.shape
    x_next = jnp.concatenate(
        [init_feature[:, 1:, :], jnp.zeros_like(init_feature[:, :1, :])], axis=1)
    x_tap = jnp.concatenate([init_feature, x_next], axis=-1).reshape(b_ * l_, 2 * e_)

    # getfeature_domain(buffer, tag): per-sample domain memory lookup
    domain_old = packed["buffer_pool"][tag]                           # [B, mid]

    # crossattention(domain_old.detach(), T_feature.detach()) — detach is inference no-op
    return _fused_forward(x_tap, es_in, domain_old, packed["wslab"])


# ---------------- main ----------------------------------------------------------------
if __name__ == "__main__":
    root = jax.random.PRNGKey(0)
    k_param, k_tok, k_ce, k_cme, k_gap, k_sty = jax.random.split(root, 6)
    params = _init_params(k_param)
    packed = _pack_params(params, BATCH, SEQ)        # one-time, frozen-weight packing

    content = jax.random.randint(k_tok, (BATCH, SEQ), 0, VOCAB, dtype=jnp.int32)
    lengths = jnp.array([SEQ, SEQ - 4], dtype=jnp.int32)
    content_masks = (jnp.arange(SEQ)[None, :] < lengths[:, None]).astype(jnp.float32)
    content_global_attention_mask = jnp.full((BATCH, SEQ), jnp.nan, dtype=jnp.float32)
    content_emotion = jax.random.normal(k_ce, (BATCH, 38), dtype=jnp.float32)
    comments_emotion = jax.random.normal(k_cme, (BATCH, 76), dtype=jnp.float32)
    emotion_gap = jax.random.normal(k_gap, (BATCH, 76), dtype=jnp.float32)
    style_feature = jax.random.normal(k_sty, (BATCH, STYLE_IN), dtype=jnp.float32)
    tag = jnp.array([0, 2], dtype=jnp.int32)

    fwd = jax.jit(generator_forward)
    domain_new = fwd(
        packed, tag,
        content=content,
        content_masks=content_masks,
        content_global_attention_mask=content_global_attention_mask,
        content_emotion=content_emotion,
        comments_emotion=comments_emotion,
        emotion_gap=emotion_gap,
        style_feature=style_feature,
    )
    domain_new = jax.block_until_ready(domain_new)
    assert domain_new.shape == (BATCH, MIDDEL_DIM)
    assert bool(jnp.all(jnp.isfinite(domain_new)))
    print("KERNEL_OK")
</pallas_src>

<mosaic_0001>
module attributes {stable_mosaic.version = 11 : i64} {
  func.func @_generator_kernel(%arg0: i32, %arg1: memref<32x64xf32, #tpu.memory_space<vmem>>, %arg2: memref<2x256xf32, #tpu.memory_space<vmem>>, %arg3: memref<2x64xf32, #tpu.memory_space<vmem>>, %arg4: memref<880x256xf32, #tpu.memory_space<vmem>>, %arg5: memref<2x64xf32, #tpu.memory_space<vmem>>) attributes {dimension_semantics = [#tpu.dimension_semantics<arbitrary>], iteration_bounds = array<i64: 1>, scalar_prefetch = 0 : i64, scratch_operands = 0 : i64, tpu.core_type = #tpu.core_type<tc>, window_params = [{pipeline_mode = #tpu.pipeline_mode<synchronous>, transform_indices = @transform_0, window_bounds = array<i64: 32, 64>}, {pipeline_mode = #tpu.pipeline_mode<synchronous>, transform_indices = @transform_1, window_bounds = array<i64: 2, 256>}, {pipeline_mode = #tpu.pipeline_mode<synchronous>, transform_indices = @transform_2, window_bounds = array<i64: 2, 64>}, {pipeline_mode = #tpu.pipeline_mode<synchronous>, transform_indices = @transform_3, window_bounds = array<i64: 880, 256>}, {pipeline_mode = #tpu.pipeline_mode<synchronous>, transform_indices = @transform_4, window_bounds = array<i64: 2, 64>}]} {
    %c0 = arith.constant 0 : index
    %c0_0 = arith.constant 0 : index
    %0 = vector.load %arg1[%c0, %c0_0] : memref<32x64xf32, #tpu.memory_space<vmem>>, vector<32x64xf32>
    %c0_1 = arith.constant 0 : index
    %c0_2 = arith.constant 0 : index
    %1 = vector.load %arg4[%c0_1, %c0_2] : memref<880x256xf32, #tpu.memory_space<vmem>>, vector<64x128xf32>
    %cst = arith.constant dense<0.000000e+00> : vector<32x128xf32>
    %2 = tpu.matmul %0, %1, %cst {dimension_numbers = #tpu.dot_dimension_numbers<[1], [0], [0], [1], [0, 0, 1, 1], [], []>} : vector<32x64xf32>, vector<64x128xf32>, vector<32x128xf32> -> vector<32x128xf32>
    %c832 = arith.constant 832 : index
    %c0_3 = arith.constant 0 : index
    %3 = vector.load %arg4[%c832, %c0_3] : memref<880x256xf32, #tpu.memory_space<vmem>>, vector<32x128xf32>
    %4 = arith.addf %2, %3 : vector<32x128xf32>
    %5 = vector.extract_strided_slice %4 {offsets = [0, 0], sizes = [16, 128], strides = [1, 1]} : vector<32x128xf32> to vector<16x128xf32>
    %cst_4 = arith.constant dense<0xFF800000> : vector<128xf32>
    %6 = vector.multi_reduction <maximumf>, %5, %cst_4 [0] : vector<16x128xf32> to vector<128xf32>
    %7 = vector.shape_cast %6 : vector<128xf32> to vector<1x128xf32>
    %8 = vector.extract_strided_slice %4 {offsets = [16, 0], sizes = [16, 128], strides = [1, 1]} : vector<32x128xf32> to vector<16x128xf32>
    %cst_5 = arith.constant dense<0xFF800000> : vector<128xf32>
    %9 = vector.multi_reduction <maximumf>, %8, %cst_5 [0] : vector<16x128xf32> to vector<128xf32>
    %10 = vector.shape_cast %9 : vector<128xf32> to vector<1x128xf32>
    %11 = tpu.concatenate %7, %10 in 0 : vector<1x128xf32>, vector<1x128xf32> -> vector<2x128xf32>
    %c864 = arith.constant 864 : index
    %c0_6 = arith.constant 0 : index
    %12 = vector.load %arg4[%c864, %c0_6] : memref<880x256xf32, #tpu.memory_space<vmem>>, vector<16x256xf32>
    %c0_7 = arith.constant 0 : index
    %c0_8 = arith.constant 0 : index
    %13 = vector.load %arg2[%c0_7, %c0_8] : memref<2x256xf32, #tpu.memory_space<vmem>>, vector<2x256xf32>
    %c64 = arith.constant 64 : index
    %c0_9 = arith.constant 0 : index
    %14 = vector.load %arg4[%c64, %c0_9] : memref<880x256xf32, #tpu.memory_space<vmem>>, vector<256x256xf32>
    %cst_10 = arith.constant dense<0.000000e+00> : vector<2x256xf32>
    %15 = tpu.matmul %13, %14, %cst_10 {dimension_numbers = #tpu.dot_dimension_numbers<[1], [0], [0], [1], [0, 0, 1, 1], [], []>} : vector<2x256xf32>, vector<256x256xf32>, vector<2x256xf32> -> vector<2x256xf32>
    %16 = vector.extract_strided_slice %12 {offsets = [0, 0], sizes = [1, 256], strides = [1, 1]} : vector<16x256xf32> to vector<1x256xf32>
    %17 = vector.broadcast %16 : vector<1x256xf32> to vector<2x256xf32>
    %18 = arith.addf %15, %17 : vector<2x256xf32>
    %cst_11 = arith.constant 0.000000e+00 : f32
    %19 = vector.broadcast %cst_11 : f32 to vector<2x256xf32>
    %20 = arith.maximumf %18, %19 : vector<2x256xf32>
    %c320 = arith.constant 320 : index
    %c0_12 = arith.constant 0 : index
    %21 = vector.load %arg4[%c320, %c0_12] : memref<880x256xf32, #tpu.memory_space<vmem>>, vector<256x256xf32>
    %cst_13 = arith.constant dense<0.000000e+00> : vector<2x256xf32>
    %22 = tpu.matmul %20, %21, %cst_13 {dimension_numbers = #tpu.dot_dimension_numbers<[1], [0], [0], [1], [0, 0, 1, 1], [], []>} : vector<2x256xf32>, vector<256x256xf32>, vector<2x256xf32> -> vector<2x256xf32>
    %23 = vector.extract_strided_slice %12 {offsets = [1, 0], sizes = [1, 256], strides = [1, 1]} : vector<16x256xf32> to vector<1x256xf32>
    %24 = vector.broadcast %23 : vector<1x256xf32> to vector<2x256xf32>
    %25 = arith.addf %22, %24 : vector<2x256xf32>
    %cst_14 = arith.constant 0.000000e+00 : f32
    %26 = vector.broadcast %cst_14 : f32 to vector<2x256xf32>
    %27 = arith.maximumf %25, %26 : vector<2x256xf32>
    %28 = vector.extract_strided_slice %11 {offsets = [0, 0], sizes = [2, 64], strides = [1, 1]} : vector<2x128xf32> to vector<2x64xf32>
    %29 = vector.extract_strided_slice %11 {offsets = [0, 64], sizes = [2, 64], strides = [1, 1]} : vector<2x128xf32> to vector<2x64xf32>
    %30 = arith.addf %28, %29 : vector<2x64xf32>
    %31 = vector.extract_strided_slice %27 {offsets = [0, 0], sizes = [2, 128], strides = [1, 1]} : vector<2x256xf32> to vector<2x128xf32>
    %32 = vector.extract_strided_slice %27 {offsets = [0, 128], sizes = [2, 128], strides = [1, 1]} : vector<2x256xf32> to vector<2x128xf32>
    %33 = arith.addf %31, %32 : vector<2x128xf32>
    %34 = vector.extract_strided_slice %33 {offsets = [0, 0], sizes = [2, 64], strides = [1, 1]} : vector<2x128xf32> to vector<2x64xf32>
    %35 = vector.extract_strided_slice %33 {offsets = [0, 64], sizes = [2, 64], strides = [1, 1]} : vector<2x128xf32> to vector<2x64xf32>
    %36 = arith.addf %34, %35 : vector<2x64xf32>
    %37 = arith.addf %30, %36 : vector<2x64xf32>
    %c576 = arith.constant 576 : index
    %c0_15 = arith.constant 0 : index
    %38 = vector.load %arg4[%c576, %c0_15] : memref<880x256xf32, #tpu.memory_space<vmem>>, vector<64x128xf32>
    %cst_16 = arith.constant dense<0.000000e+00> : vector<2x128xf32>
    %39 = tpu.matmul %37, %38, %cst_16 {dimension_numbers = #tpu.dot_dimension_numbers<[1], [0], [0], [1], [0, 0, 1, 1], [], []>} : vector<2x64xf32>, vector<64x128xf32>, vector<2x128xf32> -> vector<2x128xf32>
    %40 = vector.extract_strided_slice %12 {offsets = [2, 0], sizes = [1, 128], strides = [1, 1]} : vector<16x256xf32> to vector<1x128xf32>
    %41 = vector.broadcast %40 : vector<1x128xf32> to vector<2x128xf32>
    %42 = arith.addf %39, %41 : vector<2x128xf32>
    %43 = vector.extract_strided_slice %42 {offsets = [0, 0], sizes = [2, 64], strides = [1, 1]} : vector<2x128xf32> to vector<2x64xf32>
    %c0_17 = arith.constant 0 : index
    %c0_18 = arith.constant 0 : index
    %44 = vector.load %arg3[%c0_17, %c0_18] : memref<2x64xf32, #tpu.memory_space<vmem>>, vector<2x64xf32>
    %45 = arith.addf %44, %43 : vector<2x64xf32>
    %46 = vector.extract_strided_slice %12 {offsets = [3, 0], sizes = [1, 64], strides = [1, 1]} : vector<16x256xf32> to vector<1x64xf32>
    %47 = vector.extract_strided_slice %12 {offsets = [4, 0], sizes = [1, 64], strides = [1, 1]} : vector<16x256xf32> to vector<1x64xf32>
    %cst_19 = arith.constant dense<0.000000e+00> : vector<2xf32>
    %48 = vector.multi_reduction <add>, %45, %cst_19 [1] : vector<2x64xf32> to vector<2xf32>
    %49 = vector.shape_cast %48 : vector<2xf32> to vector<2x1xf32>
    %cst_20 = arith.constant 6.400000e+01 : f32
    %50 = vector.broadcast %cst_20 : f32 to vector<2x1xf32>
    %51 = arith.divf %49, %50 : vector<2x1xf32>
    %52 = vector.broadcast %51 : vector<2x1xf32> to vector<2x64xf32>
    %53 = arith.subf %45, %52 : vector<2x64xf32>
    %54 = arith.mulf %53, %53 : vector<2x64xf32>
    %cst_21 = arith.constant dense<0.000000e+00> : vector<2xf32>
    %55 = vector.multi_reduction <add>, %54, %cst_21 [1] : vector<2x64xf32> to vector<2xf32>
    %56 = vector.shape_cast %55 : vector<2xf32> to vector<2x1xf32>
    %cst_22 = arith.constant 6.400000e+01 : f32
    %57 = vector.broadcast %cst_22 : f32 to vector<2x1xf32>
    %58 = arith.divf %56, %57 : vector<2x1xf32>
    %59 = vector.broadcast %51 : vector<2x1xf32> to vector<2x64xf32>
    %60 = arith.subf %45, %59 : vector<2x64xf32>
    %cst_23 = arith.constant 9.99999974E-6 : f32
    %61 = vector.broadcast %cst_23 : f32 to vector<2x1xf32>
    %62 = arith.addf %58, %61 : vector<2x1xf32>
    %63 = math.rsqrt %62 : vector<2x1xf32>
    %64 = vector.broadcast %63 : vector<2x1xf32> to vector<2x64xf32>
    %65 = arith.mulf %60, %64 : vector<2x64xf32>
    %66 = vector.broadcast %46 : vector<1x64xf32> to vector<2x64xf32>
    %67 = arith.mulf %65, %66 : vector<2x64xf32>
    %68 = vector.broadcast %47 : vector<1x64xf32> to vector<2x64xf32>
    %69 = arith.addf %67, %68 : vector<2x64xf32>
    %c640 = arith.constant 640 : index
    %c0_24 = arith.constant 0 : index
    %70 = vector.load %arg4[%c640, %c0_24] : memref<880x256xf32, #tpu.memory_space<vmem>>, vector<64x128xf32>
    %cst_25 = arith.constant dense<0.000000e+00> : vector<2x128xf32>
    %71 = tpu.matmul %69, %70, %cst_25 {dimension_numbers = #tpu.dot_dimension_numbers<[1], [0], [0], [1], [0, 0, 1, 1], [], []>} : vector<2x64xf32>, vector<64x128xf32>, vector<2x128xf32> -> vector<2x128xf32>
    %72 = vector.extract_strided_slice %12 {offsets = [5, 0], sizes = [1, 128], strides = [1, 1]} : vector<16x256xf32> to vector<1x128xf32>
    %73 = vector.broadcast %72 : vector<1x128xf32> to vector<2x128xf32>
    %74 = arith.addf %71, %73 : vector<2x128xf32>
    %cst_26 = arith.constant 0.000000e+00 : f32
    %75 = vector.broadcast %cst_26 : f32 to vector<2x128xf32>
    %76 = arith.maximumf %74, %75 : vector<2x128xf32>
    %c704 = arith.constant 704 : index
    %c0_27 = arith.constant 0 : index
    %77 = vector.load %arg4[%c704, %c0_27] : memref<880x256xf32, #tpu.memory_space<vmem>>, vector<128x128xf32>
    %cst_28 = arith.constant dense<0.000000e+00> : vector<2x128xf32>
    %78 = tpu.matmul %76, %77, %cst_28 {dimension_numbers = #tpu.dot_dimension_numbers<[1], [0], [0], [1], [0, 0, 1, 1], [], []>} : vector<2x128xf32>, vector<128x128xf32>, vector<2x128xf32> -> vector<2x128xf32>
    %79 = vector.extract_strided_slice %12 {offsets = [6, 0], sizes = [1, 128], strides = [1, 1]} : vector<16x256xf32> to vector<1x128xf32>
    %80 = vector.broadcast %79 : vector<1x128xf32> to vector<2x128xf32>
    %81 = arith.addf %78, %80 : vector<2x128xf32>
    %82 = vector.extract_strided_slice %81 {offsets = [0, 0], sizes = [2, 64], strides = [1, 1]} : vector<2x128xf32> to vector<2x64xf32>
    %83 = arith.addf %69, %82 : vector<2x64xf32>
    %84 = vector.extract_strided_slice %12 {offsets = [7, 0], sizes = [1, 64], strides = [1, 1]} : vector<16x256xf32> to vector<1x64xf32>
    %85 = vector.extract_strided_slice %12 {offsets = [8, 0], sizes = [1, 64], strides = [1, 1]} : vector<16x256xf32> to vector<1x64xf32>
    %cst_29 = arith.constant dense<0.000000e+00> : vector<2xf32>
    %86 = vector.multi_reduction <add>, %83, %cst_29 [1] : vector<2x64xf32> to vector<2xf32>
    %87 = vector.shape_cast %86 : vector<2xf32> to vector<2x1xf32>
    %cst_30 = arith.constant 6.400000e+01 : f32
    %88 = vector.broadcast %cst_30 : f32 to vector<2x1xf32>
    %89 = arith.divf %87, %88 : vector<2x1xf32>
    %90 = vector.broadcast %89 : vector<2x1xf32> to vector<2x64xf32>
    %91 = arith.subf %83, %90 : vector<2x64xf32>
    %92 = arith.mulf %91, %91 : vector<2x64xf32>
    %cst_31 = arith.constant dense<0.000000e+00> : vector<2xf32>
    %93 = vector.multi_reduction <add>, %92, %cst_31 [1] : vector<2x64xf32> to vector<2xf32>
    %94 = vector.shape_cast %93 : vector<2xf32> to vector<2x1xf32>
    %cst_32 = arith.constant 6.400000e+01 : f32
    %95 = vector.broadcast %cst_32 : f32 to vector<2x1xf32>
    %96 = arith.divf %94, %95 : vector<2x1xf32>
    %97 = vector.broadcast %89 : vector<2x1xf32> to vector<2x64xf32>
    %98 = arith.subf %83, %97 : vector<2x64xf32>
    %cst_33 = arith.constant 9.99999974E-6 : f32
    %99 = vector.broadcast %cst_33 : f32 to vector<2x1xf32>
    %100 = arith.addf %96, %99 : vector<2x1xf32>
    %101 = math.rsqrt %100 : vector<2x1xf32>
    %102 = vector.broadcast %101 : vector<2x1xf32> to vector<2x64xf32>
    %103 = arith.mulf %98, %102 : vector<2x64xf32>
    %104 = vector.broadcast %84 : vector<1x64xf32> to vector<2x64xf32>
    %105 = arith.mulf %103, %104 : vector<2x64xf32>
    %106 = vector.broadcast %85 : vector<1x64xf32> to vector<2x64xf32>
    %107 = arith.addf %105, %106 : vector<2x64xf32>
    %c0_34 = arith.constant 0 : index
    %c0_35 = arith.constant 0 : index
    %108 = vector.load %arg5[%c0_34, %c0_35] : memref<2x64xf32, #tpu.memory_space<vmem>>, vector<2x64xf32>
    tpu.vector_store %arg5[%c0_34, %c0_35], %107 {strides = array<i32>} : memref<2x64xf32, #tpu.memory_space<vmem>>, vector<2x64xf32>,
    return
  }
  func.func @transform_0(%arg0: i32) -> (i32, i32) {
    %c0_i32 = arith.constant 0 : i32
    %c0_i32_0 = arith.constant 0 : i32
    %c0_i32_1 = arith.constant 0 : i32
    return %c0_i32, %c0_i32_0 : i32, i32
  }
  func.func @transform_1(%arg0: i32) -> (i32, i32) {
    %c0_i32 = arith.constant 0 : i32
    %c0_i32_0 = arith.constant 0 : i32
    %c0_i32_1 = arith.constant 0 : i32
    return %c0_i32, %c0_i32_0 : i32, i32
  }
  func.func @transform_2(%arg0: i32) -> (i32, i32) {
    %c0_i32 = arith.constant 0 : i32
    %c0_i32_0 = arith.constant 0 : i32
    %c0_i32_1 = arith.constant 0 : i32
    return %c0_i32, %c0_i32_0 : i32, i32
  }
  func.func @transform_3(%arg0: i32) -> (i32, i32) {
    %c0_i32 = arith.constant 0 : i32
    %c0_i32_0 = arith.constant 0 : i32
    %c0_i32_1 = arith.constant 0 : i32
    return %c0_i32, %c0_i32_0 : i32, i32
  }
  func.func @transform_4(%arg0: i32) -> (i32, i32) {
    %c0_i32 = arith.constant 0 : i32
    %c0_i32_0 = arith.constant 0 : i32
    %c0_i32_1 = arith.constant 0 : i32
    return %c0_i32, %c0_i32_0 : i32, i32
  }
}

</mosaic_0001>

<bundles_post_ra>
// kernel: generator_forward.1
= control target key start
LH: loop header
LB: loop body
LE: loop exit
PB: predicated region body
PF: predicated region fallthrough
CT: control target
= control target key end

     0   :  { %9 = vsyncpa [#allocation3], 0  ;;  %s1350_s0 = inlined_call_operand.vmem [shape: f32[32,64], index: 0, kind: input, shape index: {}]   ;;  %s1351_s1 = inlined_call_operand.vmem [shape: f32[2,256], index: 1, kind: input, shape index: {}]   ;;  %s1352_s2 = inlined_call_operand.vmem [shape: f32[2,64], index: 2, kind: input, shape index: {}]   ;;  %s1353_s3 = inlined_call_operand.hbm [shape: f32[880,256], index: 3, kind: input, shape index: {}]   ;;  %s1354_s4 = inlined_call_operand.hbm [shape: f32[2,64], index: 4, kind: output, shape index: {}]  }
   0x1   :  { %10 = vsyncpa [#allocation4], 0  ;;  %s1208_s15 = smov [#allocation2]   ;;  %s1160_s19 = scalar_lea.hbm %s1353_s3, 28160 }
   0x2   :  { %s22_s16 = sshll.u32 %s1208_s15, 4  ;;  %p1161_p0 = scmp.ne.s32.totalorder %s1353_s3, %s1160_s19  ;;  %s23_s16 = int_to_ptr.vmem [resolvable:$true] %s22_s16 }
   0x3   :  { %p1164_p1 = scmp.lt.u32.totalorder %s1160_s19, %s1353_s3 }
   0x5   :  { %p1166_p2 = pnand %p1164_p1, %p1161_p0 }
   0x7   :  { %1169 = shalt.err (!%p1166_p2)
}
   0x8   :  { %s1170_s24 = scalar_lea.vmem %s23_s16, 28160  ;;  %p1175_p4 = scmp.lt.s32.totalorder %s23_s16, %s23_s16 }
   0x9   :  { %p1171_p3 = scmp.ne.s32.totalorder %s23_s16, %s1170_s24  ;;  %p1176_p5 = scmp.lt.s32.totalorder %s1170_s24, %s1170_s24 }
   0xb   :  { %p1177_p6 = por %p1176_p5, %p1175_p4 }
   0xd   :  { %p1178_p7 = pnand %p1177_p6, %p1171_p3 }
   0xf   :  { %1181 = shalt.err (!%p1178_p7)
}
  0x10   :  { %s1209_s25 = smov 256   ;;  %s1210_s26 = smov 16  }
  0x11   :  { %28 = dma.hbm_to_vmem [thread:$0]  %s1353_s3, 28160, %s23_s16, [#allocation3], %s1209_s25, %s1209_s25, %s1210_s26  }
  0x12   :  { %1204 = dma.done.wait [#allocation3], 28160  }
  0x13   :  { %1205 = vsyncadd [#allocation3], 4294939136  ;;  %v167_v0 = vld [vmem:[#allocation2 + $0x88] sm:$0xff]  ;;  %v169_v1 = vld [vmem:[#allocation2 + $0x98] sm:$0xff]  ;;  %vm48_vm0 = vcmask 523264   ;;  %vm160_vm1 = vcmask 1040384  }
  0x14   :  { %v166_v2 = vld [vmem:[#allocation2 + $0x80] sm:$0xff]  ;;  %v972_v3 = vpack.c.bf16 %v169_v1, %v167_v0  ;;  %v168_v4 = vld [vmem:[#allocation2 + $0x90] sm:$0xff]  ;;  %v171_v5 = vld [vmem:[#allocation2 + $0xa8] sm:$0xff]  ;;  %vm1213_vm2 = vmmov 0   ;;  %vm566_vm3 = vcmask 517120  }
  0x15   :  { %v173_v6 = vld [vmem:[#allocation2 + $0xb8] sm:$0xff]  ;;  %v974_v7 = vpack.c.bf16 %v168_v4, %v166_v2  ;;  %v170_v9 = vld [vmem:[#allocation2 + $0xa0] sm:$0xff]  ;;  %v172_v10 = vld [vmem:[#allocation2 + $0xb0] sm:$0xff] }
  0x16   :  { %v976_v8 = vpack.c.bf16 %v173_v6, %v171_v5  ;;  %v175_v11 = vld [vmem:[#allocation2 + $0xc8] sm:$0xff]  ;;  %973 = vmatprep.subr.bf16.mxu1 %v972_v3  ;;  %v177_v12 = vld [vmem:[#allocation2 + $0xd8] sm:$0xff]  ;;  %v978_v13 = vpack.c.bf16 %v172_v10, %v170_v9  ;;  %v174_v15 = vld [vmem:[#allocation2 + $0xc0] sm:$0xff] }
  0x17   :  { %975 = vmatpush1.bf16.msra.mxu1 %v974_v7  ;;  %v980_v14 = vpack.c.bf16 %v177_v12, %v175_v11  ;;  %v176_v16 = vld [vmem:[#allocation2 + $0xd0] sm:$0xff]  ;;  %v179_v17 = vld [vmem:[#allocation2 + $0xe8] sm:$0xff]  ;;  %v181_v18 = vld [vmem:[#allocation2 + $0xf8] sm:$0xff] }
  0x18   :  { %977 = vmatprep.subr.bf16.mxu1 %v976_v8  ;;  %v982_v19 = vpack.c.bf16 %v176_v16, %v174_v15  ;;  %v984_v20 = vpack.c.bf16 %v181_v18, %v179_v17  ;;  %v178_v21 = vld [vmem:[#allocation2 + $0xe0] sm:$0xff]  ;;  %v180_v22 = vld [vmem:[#allocation2 + $0xf0] sm:$0xff]  ;;  %v183_v23 = vld [vmem:[#allocation2 + $0x108] sm:$0xff] }
  0x19   :  { %v185_v24 = vld [vmem:[#allocation2 + $0x118] sm:$0xff]  ;;  %v986_v25 = vpack.c.bf16 %v180_v22, %v178_v21  ;;  %v182_v27 = vld [vmem:[#allocation2 + $0x100] sm:$0xff]  ;;  %v184_v28 = vld [vmem:[#allocation2 + $0x110] sm:$0xff] }
  0x1a   :  { %v988_v26 = vpack.c.bf16 %v185_v24, %v183_v23  ;;  %v187_v29 = vld [vmem:[#allocation2 + $0x128] sm:$0xff]  ;;  %v189_v30 = vld [vmem:[#allocation2 + $0x138] sm:$0xff]  ;;  %v990_v31 = vpack.c.bf16 %v184_v28, %v182_v27  ;;  %v186_v33 = vld [vmem:[#allocation2 + $0x120] sm:$0xff] }
  0x1b   :  { %979 = vmatpush1.bf16.msra.mxu1 %v978_v13  ;;  %v992_v32 = vpack.c.bf16 %v189_v30, %v187_v29  ;;  %v188_v34 = vld [vmem:[#allocation2 + $0x130] sm:$0xff]  ;;  %v191_v35 = vld [vmem:[#allocation2 + $0x148] sm:$0xff]  ;;  %v193_v36 = vld [vmem:[#allocation2 + $0x158] sm:$0xff] }
  0x1c   :  { %981 = vmatprep.subr.bf16.mxu1 %v980_v14  ;;  %v994_v37 = vpack.c.bf16 %v188_v34, %v186_v33  ;;  %v190_v38 = vld [vmem:[#allocation2 + $0x140] sm:$0xff]  ;;  %v192_v39 = vld [vmem:[#allocation2 + $0x150] sm:$0xff]  ;;  %v195_v40 = vld [vmem:[#allocation2 + $0x168] sm:$0xff]  ;;  %v996_v41 = vpack.c.bf16 %v193_v36, %v191_v35 }
  0x1d   :  { %v197_v42 = vld [vmem:[#allocation2 + $0x178] sm:$0xff]  ;;  %v1256_v43 = vld.sshfl [vmem:[%s1351_s1] sm:$0x33 pattern:$0x76325410]  ;;  %v37_v46 = vld [vmem:[#allocation2 + $0x10] sm:$0xff]  ;;  %v998_v51 = vpack.c.bf16 %v192_v39, %v190_v38 }
  0x1e   :  { %v36_v44 = vld [vmem:[#allocation2] sm:$0xff]  ;;  %v246_v45 = vcombine.high %v1256_v43, %v1256_v43  ;;  %v39_v48 = vld [vmem:[#allocation2 + $0x30] sm:$0xff]  ;;  %v1000_v55 = vpack.c.bf16 %v197_v42, %v195_v40  ;;  %v199_v58 = vld [vmem:[#allocation2 + $0x188] sm:$0xff] }
  0x1f   :  { %983 = vmatpush1.bf16.msra.mxu1 %v982_v19  ;;  %v38_v47 = vld [vmem:[#allocation2 + $0x20] sm:$0xff]  ;;  %v956_v49 = vpack.c.bf16 %v37_v46, %v36_v44  ;;  %v41_v53 = vld [vmem:[#allocation2 + $0x50] sm:$0xff]  ;;  %v201_v59 = vld [vmem:[#allocation2 + $0x198] sm:$0xff] }
  0x20   :  { %985 = vmatprep.subr.bf16.mxu1 %v984_v20  ;;  %v960_v50 = vpack.c.bf16 %v39_v48, %v38_v47  ;;  %313 = vmatprep.mubr.f32.mxu1 %v246_v45  ;;  %v40_v52 = vld [vmem:[#allocation2 + $0x40] sm:$0xff]  ;;  %v196_v57 = vld [vmem:[#allocation2 + $0x170] sm:$0xff]  ;;  %v1004_v0 = vpack.c.bf16 %v201_v59, %v199_v58  ;;  %v203_v3 = vld [vmem:[#allocation2 + $0x1a8] sm:$0xff] }
  0x21   :  { %v32_v54 = vld [vmem:[%s1350_s0] sm:$0xff]  ;;  %957 = vmatprep.subr.bf16.mxu0 %v956_v49  ;;  %v964_v60 = vpack.c.bf16 %v41_v53, %v40_v52  ;;  %v43_v63 = vld [vmem:[#allocation2 + $0x70] sm:$0xff]  ;;  %v205_v4 = vld [vmem:[#allocation2 + $0x1b8] sm:$0xff] }
  0x22   :  { %v194_v56 = vld [vmem:[#allocation2 + $0x160] sm:$0xff]  ;;  %959 = vmatpush3.bf16.msra.mxu0 %v956_v49  ;;  %877 = vmatprep.mubr.msk.f32.mxu0 %vm48_vm0, %v32_v54  ;;  %v200_v2 = vld [vmem:[#allocation2 + $0x190] sm:$0xff]  ;;  %v323_v7 = vld [vmem:[#allocation2 + $0x288] sm:$0xff]  ;;  %v1008_v9 = vpack.c.bf16 %v205_v4, %v203_v3 }
  0x23   :  { %987 = vmatpush1.bf16.msra.mxu1 %v986_v25  ;;  %961 = vmatprep.subr.bf16.mxu0 %v960_v50  ;;  %v1002_v61 = vpack.c.bf16 %v196_v57, %v194_v56  ;;  %v42_v62 = vld [vmem:[#allocation2 + $0x60] sm:$0xff]  ;;  %v325_v8 = vld [vmem:[#allocation2 + $0x298] sm:$0xff]  ;;  %v204_v11 = vld [vmem:[#allocation2 + $0x1b0] sm:$0xff] }
  0x24   :  { %989 = vmatprep.subr.bf16.mxu1 %v988_v26  ;;  %v198_v1 = vld [vmem:[#allocation2 + $0x180] sm:$0xff]  ;;  %v968_v5 = vpack.c.bf16 %v43_v63, %v42_v62  ;;  %v207_v12 = vld [vmem:[#allocation2 + $0x1c8] sm:$0xff]  ;;  %v209_v13 = vld [vmem:[#allocation2 + $0x1d8] sm:$0xff]  ;;  %v1036_v14 = vpack.c.bf16 %v325_v8, %v323_v7 }
  0x25   :  { %v1006_v6 = vpack.c.bf16 %v200_v2, %v198_v1  ;;  %v202_v10 = vld [vmem:[#allocation2 + $0x1a0] sm:$0xff]  ;;  %v324_v16 = vld [vmem:[#allocation2 + $0x290] sm:$0xff]  ;;  %v327_v18 = vld [vmem:[#allocation2 + $0x2a8] sm:$0xff]  ;;  %v1012_v20 = vpack.c.bf16 %v209_v13, %v207_v12 }
  0x26   :  { %963 = vmatpush3.bf16.msra.mxu0 %v960_v50  ;;  %v322_v15 = vld [vmem:[#allocation2 + $0x280] sm:$0xff]  ;;  %v1010_v17 = vpack.c.bf16 %v204_v11, %v202_v10  ;;  %v329_v19 = vld [vmem:[#allocation2 + $0x2b8] sm:$0xff]  ;;  %v208_v22 = vld [vmem:[#allocation2 + $0x1d0] sm:$0xff] }
  0x27   :  { %991 = vmatpush1.bf16.msra.mxu1 %v990_v31  ;;  %965 = vmatprep.subr.bf16.mxu0 %v964_v60  ;;  %v206_v21 = vld [vmem:[#allocation2 + $0x1c0] sm:$0xff]  ;;  %v211_v23 = vld [vmem:[#allocation2 + $0x1e8] sm:$0xff]  ;;  %v213_v24 = vld [vmem:[#allocation2 + $0x1f8] sm:$0xff]  ;;  %v1038_v26 = vpack.c.bf16 %v324_v16, %v322_v15  ;;  %v1040_v28 = vpack.c.bf16 %v329_v19, %v327_v18 }
  0x28   :  { %993 = vmatprep.subr.bf16.mxu1 %v992_v32  ;;  %v33_v25 = vld [vmem:[%s1350_s0 + $0x8] sm:$0xff]  ;;  %v34_v27 = vld [vmem:[%s1350_s0 + $0x10] sm:$0xff]  ;;  %v326_v29 = vld [vmem:[#allocation2 + $0x2a0] sm:$0xff]  ;;  %v1014_v31 = vpack.c.bf16 %v208_v22, %v206_v21  ;;  %v1016_v34 = vpack.c.bf16 %v213_v24, %v211_v23 }
  0x29   :  { %v328_v30 = vld [vmem:[#allocation2 + $0x2b0] sm:$0xff]  ;;  %v331_v32 = vld [vmem:[#allocation2 + $0x2c8] sm:$0xff]  ;;  %v333_v33 = vld [vmem:[#allocation2 + $0x2d8] sm:$0xff] }
  0x2a   :  { %967 = vmatpush3.bf16.msra.mxu0 %v964_v60  ;;  %v210_v35 = vld [vmem:[#allocation2 + $0x1e0] sm:$0xff]  ;;  %v212_v36 = vld [vmem:[#allocation2 + $0x1f0] sm:$0xff]  ;;  %v217_v38 = vld [vmem:[#allocation2 + $0x218] sm:$0xff]  ;;  %v1042_v40 = vpack.c.bf16 %v328_v30, %v326_v29 }
  0x2b   :  { %995 = vmatpush1.bf16.msra.mxu1 %v994_v37  ;;  %969 = vmatprep.subr.bf16.mxu0 %v968_v5  ;;  %v215_v37 = vld [vmem:[#allocation2 + $0x208] sm:$0xff]  ;;  %v35_v39 = vld [vmem:[%s1350_s0 + $0x18] sm:$0xff]  ;;  %v330_v42 = vld [vmem:[#allocation2 + $0x2c0] sm:$0xff]  ;;  %v1018_v45 = vpack.c.bf16 %v212_v36, %v210_v35  ;;  %s1211_s0 = smov 64  }
  0x2c   :  { %997 = vmatprep.subr.bf16.mxu1 %v996_v41  ;;  %v1044_v41 = vpack.c.bf16 %v333_v33, %v331_v32  ;;  %v332_v44 = vld [vmem:[#allocation2 + $0x2d0] sm:$0xff]  ;;  %v335_v46 = vld [vmem:[#allocation2 + $0x2e8] sm:$0xff]  ;;  %v337_v47 = vld [vmem:[#allocation2 + $0x2f8] sm:$0xff]  ;;  %v1020_v48 = vpack.c.bf16 %v217_v38, %v215_v37 }
  0x2d   :  { %v214_v49 = vld [vmem:[#allocation2 + $0x200] sm:$0xff]  ;;  %v216_v50 = vld [vmem:[#allocation2 + $0x210] sm:$0xff]  ;;  %v221_v52 = vld [vmem:[#allocation2 + $0x238] sm:$0xff]  ;;  %v1046_v53 = vpack.c.bf16 %v332_v44, %v330_v42  ;;  %v1048_v54 = vpack.c.bf16 %v337_v47, %v335_v46 }
  0x2e   :  { %971 = vmatpush3.bf16.msra.mxu0 %v968_v5  ;;  %v336_v56 = vld [vmem:[#allocation2 + $0x2f0] sm:$0xff]  ;;  %v1022_v57 = vpack.c.bf16 %v216_v50, %v214_v49  ;;  %v339_v58 = vld [vmem:[#allocation2 + $0x308] sm:$0xff]  ;;  %v341_v59 = vld [vmem:[#allocation2 + $0x318] sm:$0xff] }
  0x2f   :  { %999 = vmatpush1.bf16.msra.mxu1 %v998_v51  ;;  %1037 = vmatprep.subr.bf16.mxu0 %v1036_v14  ;;  %v219_v51 = vld [vmem:[#allocation2 + $0x228] sm:$0xff]  ;;  %v220_v62 = vld [vmem:[#allocation2 + $0x230] sm:$0xff]  ;;  %v1052_v2 = vpack.c.bf16 %v341_v59, %v339_v58  ;;  %v338_v3 = vld [vmem:[#allocation2 + $0x300] sm:$0xff] }
  0x30   :  { %1001 = vmatprep.subr.bf16.mxu1 %v1000_v55  ;;  %v334_v55 = vld [vmem:[#allocation2 + $0x2e0] sm:$0xff]  ;;  %v1024_v60 = vpack.c.bf16 %v221_v52, %v219_v51  ;;  %v223_v63 = vld [vmem:[#allocation2 + $0x248] sm:$0xff]  ;;  %v340_v4 = vld [vmem:[#allocation2 + $0x310] sm:$0xff] }
  0x31   :  { %878 = vmatmul.mubr.msk.f32.vlgmr.msra.gmra.mrb[0].mxu0 %vm48_vm0, %v33_v25  ;;  %v1050_v1 = vpack.c.bf16 %v336_v56, %v334_v55  ;;  %v345_v7 = vld [vmem:[#allocation2 + $0x338] sm:$0xff]  ;;  %v224_v10 = vld [vmem:[#allocation2 + $0x250] sm:$0xff]  ;;  %v227_v11 = vld [vmem:[#allocation2 + $0x268] sm:$0xff]  ;;  %v1054_v13 = vpack.c.bf16 %v340_v4, %v338_v3 }
  0x32   :  { %880 = vmatprep.mubr.msk.f32.mxu0 %vm48_vm0, %v34_v27  ;;  %1039 = vmatpush1.bf16.msra.mxu0 %v1038_v26  ;;  %v229_v12 = vld [vmem:[#allocation2 + $0x278] sm:$0xff]  ;;  %v342_v15 = vld [vmem:[#allocation2 + $0x320] sm:$0xff]  ;;  %v344_v16 = vld [vmem:[#allocation2 + $0x330] sm:$0xff] }
  0x33   :  { %1003 = vmatpush1.bf16.msra.mxu1 %v1002_v61  ;;  %1041 = vmatprep.subr.bf16.mxu0 %v1040_v28  ;;  %v218_v61 = vld [vmem:[#allocation2 + $0x220] sm:$0xff]  ;;  %v347_v18 = vld [vmem:[#allocation2 + $0x348] sm:$0xff]  ;;  %v349_v19 = vld [vmem:[#allocation2 + $0x358] sm:$0xff]  ;;  %v1058_v23 = vpack.c.bf16 %v344_v16, %v342_v15 }
  0x34   :  { %1005 = vmatprep.subr.bf16.mxu1 %v1004_v0  ;;  %v225_v0 = vld [vmem:[#allocation2 + $0x258] sm:$0xff]  ;;  %v1026_v5 = vpack.c.bf16 %v220_v62, %v218_v61  ;;  %v226_v21 = vld [vmem:[#allocation2 + $0x260] sm:$0xff]  ;;  %v228_v22 = vld [vmem:[#allocation2 + $0x270] sm:$0xff]  ;;  %v1060_v24 = vpack.c.bf16 %v349_v19, %v347_v18 }
  0x35   :  { %881 = vmatmul.mubr.msk.f32.gmra.mrb[2].mxu0 %vm48_vm0, %v35_v39  ;;  %v1028_v8 = vpack.c.bf16 %v225_v0, %v223_v63  ;;  %v346_v25 = vld [vmem:[#allocation2 + $0x340] sm:$0xff]  ;;  %v348_v26 = vld [vmem:[#allocation2 + $0x350] sm:$0xff]  ;;  %v1034_v27 = vpack.c.bf16 %v228_v22, %v226_v21  ;;  %v351_v28 = vld [vmem:[#allocation2 + $0x368] sm:$0xff] }
  0x36   :  { %1043 = vmatpush1.bf16.msra.mxu0 %v1042_v40  ;;  %v353_v29 = vld [vmem:[#allocation2 + $0x378] sm:$0xff]  ;;  %v1062_v30 = vpack.c.bf16 %v348_v26, %v346_v25  ;;  %v350_v32 = vld [vmem:[#allocation2 + $0x360] sm:$0xff]  ;;  %v352_v33 = vld [vmem:[#allocation2 + $0x370] sm:$0xff] }
  0x37   :  { %1007 = vmatpush1.bf16.msra.mxu1 %v1006_v6  ;;  %1045 = vmatprep.subr.bf16.mxu0 %v1044_v41  ;;  %v343_v6 = vld [vmem:[#allocation2 + $0x328] sm:$0xff]  ;;  %v357_v35 = vld [vmem:[#allocation2 + $0x398] sm:$0xff]  ;;  %v1066_v36 = vpack.c.bf16 %v352_v33, %v350_v32  ;;  %v354_v38 = vld [vmem:[#allocation2 + $0x380] sm:$0xff] }
  0x38   :  { %1009 = vmatprep.subr.bf16.mxu1 %v1008_v9  ;;  %v222_v9 = vld [vmem:[#allocation2 + $0x240] sm:$0xff]  ;;  %v1056_v14 = vpack.c.bf16 %v345_v7, %v343_v6  ;;  %v356_v39 = vld [vmem:[#allocation2 + $0x390] sm:$0xff]  ;;  %v359_v40 = vld [vmem:[#allocation2 + $0x3a8] sm:$0xff] }
  0x39   :  { %v361_v41 = vld [vmem:[#allocation2 + $0x3b8] sm:$0xff]  ;;  %v1070_v42 = vpack.c.bf16 %v356_v39, %v354_v38  ;;  %v360_v46 = vld [vmem:[#allocation2 + $0x3b0] sm:$0xff]  ;;  %v363_v47 = vld [vmem:[#allocation2 + $0x3c8] sm:$0xff] }
  0x3a   :  { %1047 = vmatpush1.bf16.msra.mxu0 %v1046_v53  ;;  %v1072_v44 = vpack.c.bf16 %v361_v41, %v359_v40  ;;  %v362_v51 = vld [vmem:[#allocation2 + $0x3c0] sm:$0xff]  ;;  %v367_v52 = vld [vmem:[#allocation2 + $0x3e8] sm:$0xff]  ;;  %v369_v53 = vld [vmem:[#allocation2 + $0x3f8] sm:$0xff] }
  0x3b   :  { %1011 = vmatpush1.bf16.msra.mxu1 %v1010_v17  ;;  %1049 = vmatprep.subr.bf16.mxu0 %v1048_v54  ;;  %v1030_v17 = vpack.c.bf16 %v224_v10, %v222_v9  ;;  %v1080_v55 = vpack.c.bf16 %v369_v53, %v367_v52  ;;  %v366_v56 = vld [vmem:[#allocation2 + $0x3e0] sm:$0xff]  ;;  %v371_v58 = vld [vmem:[#allocation2 + $0x408] sm:$0xff]  ;;  %v373_v59 = vld [vmem:[#allocation2 + $0x418] sm:$0xff] }
  0x3c   :  { %1013 = vmatprep.subr.bf16.mxu1 %v1012_v20  ;;  %v1032_v20 = vpack.c.bf16 %v229_v12, %v227_v11  ;;  %v1084_v61 = vpack.c.bf16 %v373_v59, %v371_v58  ;;  %v370_v62 = vld [vmem:[#allocation2 + $0x400] sm:$0xff]  ;;  %v372_v63 = vld [vmem:[#allocation2 + $0x410] sm:$0xff]  ;;  %v375_v0 = vld [vmem:[#allocation2 + $0x428] sm:$0xff] }
  0x3d   :  { %v374_v4 = vld [vmem:[#allocation2 + $0x420] sm:$0xff]  ;;  %v379_v6 = vld [vmem:[#allocation2 + $0x448] sm:$0xff]  ;;  %v381_v7 = vld [vmem:[#allocation2 + $0x458] sm:$0xff] }
  0x3e   :  { %1051 = vmatpush1.bf16.msra.mxu0 %v1050_v1  ;;  %v377_v1 = vld [vmem:[#allocation2 + $0x438] sm:$0xff]  ;;  %v1092_v9 = vpack.c.bf16 %v381_v7, %v379_v6  ;;  %v378_v10 = vld [vmem:[#allocation2 + $0x440] sm:$0xff]  ;;  %v380_v11 = vld [vmem:[#allocation2 + $0x450] sm:$0xff] }
  0x3f   :  { %1015 = vmatpush1.bf16.msra.mxu1 %v1014_v31  ;;  %1053 = vmatprep.subr.bf16.mxu0 %v1052_v2  ;;  %v1064_v31 = vpack.c.bf16 %v353_v29, %v351_v28  ;;  %v1086_v2 = vpack.c.bf16 %v372_v63, %v370_v62  ;;  %v1088_v3 = vpack.c.bf16 %v377_v1, %v375_v0  ;;  %v382_v16 = vld [vmem:[#allocation2 + $0x460] sm:$0xff]  ;;  %v45_v19 = vld [vmem:[#allocation2 + $0x690] sm:$0xff]  ;;  %v1212_v62 = vmov 0.0|0.0  }
  0x40   :  { %1017 = vmatprep.subr.bf16.mxu1 %v1016_v34  ;;  %v355_v34 = vld [vmem:[#allocation2 + $0x388] sm:$0xff]  ;;  %v1094_v12 = vpack.c.bf16 %v380_v11, %v378_v10  ;;  %v47_v25 = vld [vmem:[#allocation2 + $0x6b0] sm:$0xff]  ;;  %v46_v26 = vld [vmem:[#allocation2 + $0x6a0] sm:$0xff]  ;;  %v1214_v11 = vmov 0.0  }
  0x41   :  { %v1068_v37 = vpack.c.bf16 %v357_v35, %v355_v34  ;;  %v479_v59 = vld [vmem:[#allocation2 + $0x480] sm:$0xff]  ;;  %v482_v0 = vld [vmem:[#allocation2 + $0x4b0] sm:$0xff] }
  0x42   :  { %1055 = vmatpush1.bf16.msra.mxu0 %v1054_v13  ;;  %v383_v13 = vld [vmem:[#allocation2 + $0x468] sm:$0xff]  ;;  %v485_v6 = vld [vmem:[#allocation2 + $0x4e0] sm:$0xff]  ;;  %v486_v7 = vld [vmem:[#allocation2 + $0x4f0] sm:$0xff] }
  0x43   :  { %1019 = vmatpush1.bf16.msra.mxu1 %v1018_v45  ;;  %1057 = vmatprep.subr.bf16.mxu0 %v1056_v14  ;;  %v358_v45 = vld [vmem:[#allocation2 + $0x3a0] sm:$0xff]  ;;  %v385_v14 = vld [vmem:[#allocation2 + $0x478] sm:$0xff] }
  0x44   :  { %1021 = vmatprep.subr.bf16.mxu1 %v1020_v48  ;;  %v365_v48 = vld [vmem:[#allocation2 + $0x3d8] sm:$0xff]  ;;  %v1074_v49 = vpack.c.bf16 %v360_v46, %v358_v45  ;;  %v1096_v15 = vpack.c.bf16 %v385_v14, %v383_v13 }
  0x45   :  { %v1076_v50 = vpack.c.bf16 %v365_v48, %v363_v47  ;;  %v1282_v48 = vld [vmem:[#allocation2 + $0x6c0] sm:$0xff] }
  0x46   :  { %1059 = vmatpush1.bf16.msra.mxu0 %v1058_v23 }
  0x47   :  { %1023 = vmatpush1.bf16.msra.mxu1 %v1022_v57  ;;  %1061 = vmatprep.subr.bf16.mxu0 %v1060_v24  ;;  %v368_v57 = vld [vmem:[#allocation2 + $0x3f0] sm:$0xff] }
  0x48   :  { %1025 = vmatprep.subr.bf16.mxu1 %v1024_v60  ;;  %v1082_v60 = vpack.c.bf16 %v368_v57, %v366_v56 }
  0x4a   :  { %1063 = vmatpush1.bf16.msra.mxu0 %v1062_v30 }
  0x4b   :  { %1027 = vmatpush1.bf16.msra.mxu1 %v1026_v5  ;;  %1065 = vmatprep.subr.bf16.mxu0 %v1064_v31  ;;  %v376_v5 = vld [vmem:[#allocation2 + $0x430] sm:$0xff] }
  0x4c   :  { %1029 = vmatprep.subr.bf16.mxu1 %v1028_v8  ;;  %v1090_v8 = vpack.c.bf16 %v376_v5, %v374_v4 }
  0x4e   :  { %1067 = vmatpush1.bf16.msra.mxu0 %v1066_v36 }
  0x4f   :  { %1031 = vmatpush1.bf16.msra.mxu1 %v1030_v17  ;;  %1069 = vmatprep.subr.bf16.mxu0 %v1068_v37  ;;  %v384_v17 = vld [vmem:[#allocation2 + $0x470] sm:$0xff]  ;;  %v230_v37 = vlaneseq }
  0x50   :  { %1033 = vmatprep.subr.bf16.mxu1 %v1032_v20  ;;  %v1098_v18 = vpack.c.bf16 %v384_v17, %v382_v16  ;;  %v44_v20 = vld [vmem:[#allocation2 + $0x680] sm:$0xff] }
  0x52   :  { %1071 = vmatpush1.bf16.msra.mxu0 %v1070_v42  ;;  %v1277_v42 = vshrl.u32 %v230_v37, 7  ;;  %v591_v37 = vld [vmem:[#allocation2 + $0x500] sm:$0xff] }
  0x53   :  { %1035 = vmatpush1.bf16.msra.mxu1 %v1034_v27  ;;  %1073 = vmatprep.subr.bf16.mxu0 %v1072_v44 }
  0x54   :  { %v1280_v47 = vsub.s32 0, %v1277_v42  ;;  %1100 = vmatprep.subr.bf16.mxu1 %v1212_v62  ;;  %v388_v5 = vsub.s32 1, %v1277_v42 }
  0x56   :  { %314 = vmatmul.mubr.f32.vlgmr.msra.gmra.mrb[0].mxu1 %v1256_v43  ;;  %v364_v43 = vld [vmem:[#allocation2 + $0x3d0] sm:$0xff]  ;;  %1075 = vmatpush1.bf16.msra.mxu0 %v1074_v49 }
  0x57   :  { %v1078_v54 = vpack.c.bf16 %v364_v43, %v362_v51  ;;  %1077 = vmatprep.subr.bf16.mxu0 %v1076_v50  ;;  %v163_v50 = vld [vmem:[#allocation2 + $0x6c8] sm:$0xff]  ;;  %v233_v43 = vrot.slane %v1282_v48, %v1280_v47  ;;  %899 = vmatprep.mubr.msk.f32.mxu1 %vm1213_vm2, %v1214_v11 }
  0x58   :  { %v237_v52 = vrot.slane %v163_v50, %v1280_v47  ;;  %v393_v10 = vrot.slane %v163_v50, %v388_v5  ;;  %v597_v50 = vld [vmem:[#allocation2 + $0x560] sm:$0xff] }
  0x5a   :  { %1079 = vmatpush1.bf16.msra.mxu0 %v1078_v54 }
  0x5b   :  { %1081 = vmatprep.subr.bf16.mxu0 %v1080_v55 }
  0x5e   :  { %1083 = vmatpush1.bf16.msra.mxu0 %v1082_v60  ;;  %v480_v60 = vld [vmem:[#allocation2 + $0x490] sm:$0xff] }
  0x5f   :  { %1085 = vmatprep.subr.bf16.mxu0 %v1084_v61  ;;  %v481_v61 = vld [vmem:[#allocation2 + $0x4a0] sm:$0xff]  ;;  %v1101_v63 = vpack.c.bf16 %v480_v60, %v479_v59  ;;  %v682_v59 = vld [vmem:[#allocation2 + $0x5d0] sm:$0xff] }
  0x60   :  { %v1104_v1 = vpack.c.bf16 %v482_v0, %v481_v61  ;;  %v683_v61 = vld [vmem:[#allocation2 + $0x5e0] sm:$0xff] }
  0x61   :  { %1102 = vmatpush3.bf16.msra.mxu1 %v1101_v63  ;;  %v684_v63 = vld [vmem:[#allocation2 + $0x5f0] sm:$0xff] }
  0x62   :  { %1087 = vmatpush1.bf16.msra.mxu0 %v1086_v2  ;;  %1103 = vmatprep.subr.bf16.mxu1 %v1212_v62  ;;  %v483_v2 = vld [vmem:[#allocation2 + $0x4c0] sm:$0xff]  ;;  %v1134_v0 = vpack.c.bf16 %v684_v63, %v683_v61 }
  0x63   :  { %1089 = vmatprep.subr.bf16.mxu0 %v1088_v3  ;;  %v484_v3 = vld [vmem:[#allocation2 + $0x4d0] sm:$0xff] }
  0x64   :  { %v1107_v4 = vpack.c.bf16 %v484_v3, %v483_v2  ;;  %v686_v2 = vld [vmem:[#allocation2 + $0x610] sm:$0xff] }
  0x65   :  { %1105 = vmatpush3.bf16.msra.mxu1 %v1104_v1  ;;  %v685_v1 = vld [vmem:[#allocation2 + $0x600] sm:$0xff] }
  0x66   :  { %1091 = vmatpush1.bf16.msra.mxu0 %v1090_v8  ;;  %1106 = vmatprep.subr.bf16.mxu1 %v1212_v62  ;;  %v1110_v8 = vpack.c.bf16 %v486_v7, %v485_v6  ;;  %v1137_v3 = vpack.c.bf16 %v686_v2, %v685_v1  ;;  %v689_v7 = vld [vmem:[#allocation2 + $0x640] sm:$0xff] }
  0x67   :  { %1093 = vmatprep.subr.bf16.mxu0 %v1092_v9  ;;  %v389_v9 = vrot.slane %v1282_v48, %v388_v5  ;;  %v688_v5 = vld [vmem:[#allocation2 + $0x630] sm:$0xff] }
  0x69   :  { %1108 = vmatpush3.bf16.msra.mxu1 %v1107_v4  ;;  %v687_v4 = vld [vmem:[#allocation2 + $0x620] sm:$0xff] }
  0x6a   :  { %1095 = vmatpush1.bf16.msra.mxu0 %v1094_v12  ;;  %1109 = vmatprep.subr.bf16.mxu1 %v1212_v62  ;;  %v1140_v6 = vpack.c.bf16 %v688_v5, %v687_v4 }
  0x6b   :  { %1097 = vmatprep.subr.bf16.mxu0 %v1096_v15 }
  0x6d   :  { %1111 = vmatpush3.bf16.msra.mxu1 %v1110_v8  ;;  %v690_v8 = vld [vmem:[#allocation2 + $0x650] sm:$0xff] }
  0x6e   :  { %1099 = vmatpush1.bf16.msra.mxu0 %v1098_v18  ;;  %1124 = vmatprep.subr.bf16.mxu1 %v1212_v62 }
  0x6f   :  { %1112 = vmatprep.subr.bf16.mxu0 %v1212_v62 }
 0x104   :  { %v879_v21 = vpop.f32.mrb[0].mxu0 }
 0x105   :  { %v133_v22 = vadd.f32 %v879_v21, %v45_v19  ;;  %v127_v23 = vpop.f32.mrb[1].mxu0 }
 0x106   :  { %v128_v24 = vadd.f32 %v127_v23, %v44_v20 }
 0x108   :  { %v146_v27 = vmax.f32 %v128_v24, %v133_v22  ;;  %v882_v28 = vpop.f32.mrb[2].mxu0  ;;  %v489_v24 = vsub.s32 2, %v1277_v42 }
 0x109   :  { %v143_v29 = vadd.f32 %v882_v28, %v47_v25  ;;  %v137_v30 = vpop.f32.mrb[3].mxu0 }
 0x10a   :  { %v147_v31 = vrot.slane %v146_v27, 4  ;;  %v138_v32 = vadd.f32 %v137_v30, %v46_v26  ;;  %v490_v25 = vrot.slane %v1282_v48, %v489_v24 }
 0x10c   :  { %v148_v33 = vmax.f32 %v146_v27, %v147_v31  ;;  %v153_v34 = vmax.f32 %v138_v32, %v143_v29  ;;  %v564_v27 = vld [vmem:[%s1352_s2] sm:$0x3]  ;;  %s1215_s2 = smov [#allocation5]  }
 0x10d   :  { %s798_s13 = sshll.u32 %s1215_s2, 4  ;;  %s799_s13 = int_to_ptr.vmem [resolvable:$true] %s798_s13 }
 0x10e   :  { %v149_v35 = vrot.slane %v148_v33, 2  ;;  %v154_v36 = vrot.slane %v153_v34, 4  ;;  %s1182_s14 = scalar_lea.vmem %s799_s13, 32  ;;  %p1187_p9 = scmp.lt.s32.totalorder %s799_s13, %s799_s13 }
 0x10f   :  { %p1183_p8 = scmp.ne.s32.totalorder %s799_s13, %s1182_s14  ;;  %p1188_p10 = scmp.lt.s32.totalorder %s1182_s14, %s1182_s14 }
 0x110   :  { %v150_v38 = vmax.f32 %v148_v33, %v149_v35  ;;  %v155_v39 = vmax.f32 %v153_v34, %v154_v36 }
 0x111   :  { %p1189_p11 = por %p1188_p10, %p1187_p9 }
 0x112   :  { %v156_v40 = vrot.slane %v155_v39, 2  ;;  %v151_v41 = vrot.slane %v150_v38, 1 }
 0x113   :  { %p1190_p12 = pnand %p1189_p11, %p1183_p8 }
 0x114   :  { %v157_v44 = vmax.f32 %v155_v39, %v156_v40  ;;  %v152_v45 = vmax.f32 %v150_v38, %v151_v41  ;;  %v592_v38 = vld [vmem:[#allocation2 + $0x510] sm:$0xff]  ;;  %v593_v40 = vld [vmem:[#allocation2 + $0x520] sm:$0xff] }
 0x115   :  { %v1113_v39 = vpack.c.bf16 %v592_v38, %v591_v37  ;;  %v594_v41 = vld [vmem:[#allocation2 + $0x530] sm:$0xff] }
 0x116   :  { %v158_v46 = vrot.slane %v157_v44, 1 }
 0x118   :  { %v159_v49 = vmax.f32 %v157_v44, %v158_v46  ;;  %v1116_v44 = vpack.c.bf16 %v594_v41, %v593_v40  ;;  %v596_v46 = vld [vmem:[#allocation2 + $0x550] sm:$0xff] }
 0x11a   :  { %v161_v51 = vsel %vm160_vm1, %v152_v45, %v159_v49  ;;  %v595_v45 = vld [vmem:[#allocation2 + $0x540] sm:$0xff] }
 0x11b   :  { %468 = vrot.lane.b32.xlu0 %v161_v51, %s1211_s0  ;;  %v1119_v49 = vpack.c.bf16 %v596_v46, %v595_v45  ;;  %v783_v46 = vsub.s32 7, %v1277_v42 }
 0x129   :  { %v315_v53 = vpop.f32.mrb[0].mxu1 }
 0x12a   :  { %v316_v54 = vadd.f32 %v315_v53, %v233_v43  ;;  %v317_v55 = vpop.f32.mrb[1].mxu1  ;;  %v678_v53 = vld [vmem:[#allocation2 + $0x590] sm:$0xff] }
 0x12b   :  { %v318_v56 = vadd.f32 %v317_v55, %v237_v52  ;;  %v677_v52 = vld [vmem:[#allocation2 + $0x580] sm:$0xff] }
 0x12c   :  { %v320_v58 = vmax.f32 %v316_v54, 0.0  ;;  %v679_v54 = vld [vmem:[#allocation2 + $0x5a0] sm:$0xff]  ;;  %v1125_v55 = vpack.c.bf16 %v678_v53, %v677_v52 }
 0x12d   :  { %v321_v57 = vmax.f32 %v318_v56, 0.0  ;;  %v680_v56 = vld [vmem:[#allocation2 + $0x5b0] sm:$0xff] }
 0x12f   :  { %458 = vmatprep.mubr.f32.mxu0 %v321_v57  ;;  %v1128_v57 = vpack.c.bf16 %v680_v56, %v679_v54 }
 0x130   :  { %459 = vmatmul.mubr.f32.vlgmr.msra.gmra.mrb[4].mxu0 %v320_v58  ;;  %v681_v58 = vld [vmem:[#allocation2 + $0x5c0] sm:$0xff] }
 0x131   :  { %918 = vmatprep.mubr.msk.f32.mxu0 %vm1213_vm2, %v1214_v11  ;;  %1114 = vmatpush3.bf16.msra.mxu0 %v1113_v39  ;;  %v1131_v60 = vpack.c.bf16 %v682_v59, %v681_v58 }
 0x132   :  { %1115 = vmatprep.subr.bf16.mxu0 %v1212_v62 }
 0x135   :  { %1117 = vmatpush3.bf16.msra.mxu0 %v1116_v44 }
 0x136   :  { %1118 = vmatprep.subr.bf16.mxu0 %v1212_v62 }
 0x139   :  { %1120 = vmatpush3.bf16.msra.mxu0 %v1119_v49  ;;  %v164_v49 = vld [vmem:[#allocation2 + $0x6d0] sm:$0xff] }
 0x13a   :  { %1121 = vmatprep.subr.bf16.mxu0 %v1212_v62  ;;  %v789_v52 = vrot.slane %v164_v49, %v1280_v47 }
 0x18d   :  { %v469_v19 = vpop.permute.xlu0 %468 }
 0x18e   :  { %v471_v21 = vadd.f32 %v469_v19, %v161_v51  ;;  %v598_v51 = vld [vmem:[#allocation2 + $0x570] sm:$0xff] }
 0x18f   :  { %v1122_v43 = vpack.c.bf16 %v598_v51, %v597_v50  ;;  %v784_v50 = vrot.slane %v1282_v48, %v783_v46 }
 0x191   :  { %1123 = vmatpush3.bf16.msra.mxu0 %v1122_v43 }
 0x203   :  { %v460_v12 = vpop.f32.mrb[4].mxu0 }
 0x204   :  { %v461_v13 = vadd.f32 %v460_v12, %v389_v9  ;;  %v462_v14 = vpop.f32.mrb[5].mxu0  ;;  %v1143_v9 = vpack.c.bf16 %v690_v8, %v689_v7 }
 0x205   :  { %v463_v15 = vadd.f32 %v462_v14, %v393_v10  ;;  %v588_v14 = vsub.s32 4, %v1277_v42 }
 0x206   :  { %v465_v16 = vmax.f32 %v461_v13, 0.0  ;;  %v583_v13 = vsub.s32 3, %v1277_v42 }
 0x207   :  { %v466_v17 = vmax.f32 %v463_v15, 0.0 }
 0x208   :  { %v584_v15 = vrot.slane %v1282_v48, %v583_v13 }
 0x209   :  { %v472_v18 = vadd.f32 %v466_v17, %v465_v16 }
 0x20b   :  { %474 = vrot.lane.b32.xlu0 %v472_v18, %s1211_s0 }
 0x27d   :  { %v475_v20 = vpop.permute.xlu0 %474 }
 0x27e   :  { %v477_v22 = vadd.f32 %v475_v20, %v472_v18  ;;  %v589_v18 = vrot.slane %v1282_v48, %v588_v14 }
 0x280   :  { %v478_v23 = vadd.f32 %v477_v22, %v471_v21  ;;  %v692_v21 = vld [vmem:[#allocation2 + $0x670] sm:$0xff] }
 0x282   :  { %900 = vmatmul.mubr.msk.f32.vlgmr.msra.gmra.mrb[2].mxu1 %vm48_vm0, %v478_v23  ;;  %v601_v23 = vsub.s32 5, %v1277_v42 }
 0x283   :  { %953 = vmatprep.mubr.msk.f32.mxu1 %vm1213_vm2, %v1214_v11  ;;  %1126 = vmatpush3.bf16.msra.mxu1 %v1125_v55 }
 0x284   :  { %1127 = vmatprep.subr.bf16.mxu1 %v1212_v62  ;;  %v602_v24 = vrot.slane %v1282_v48, %v601_v23 }
 0x287   :  { %1129 = vmatpush3.bf16.msra.mxu1 %v1128_v57 }
 0x288   :  { %1130 = vmatprep.subr.bf16.mxu1 %v1212_v62 }
 0x28b   :  { %1132 = vmatpush3.bf16.msra.mxu1 %v1131_v60 }
 0x28c   :  { %1133 = vmatprep.subr.bf16.mxu1 %v1212_v62 }
 0x28f   :  { %1135 = vmatpush3.bf16.msra.mxu1 %v1134_v0 }
 0x290   :  { %1136 = vmatprep.subr.bf16.mxu1 %v1212_v62 }
 0x293   :  { %1138 = vmatpush3.bf16.msra.mxu1 %v1137_v3 }
 0x294   :  { %1139 = vmatprep.subr.bf16.mxu1 %v1212_v62 }
 0x297   :  { %1141 = vmatpush3.bf16.msra.mxu1 %v1140_v6 }
 0x298   :  { %1142 = vmatprep.subr.bf16.mxu1 %v1212_v62 }
 0x29b   :  { %1144 = vmatpush3.bf16.msra.mxu1 %v1143_v9 }
 0x29c   :  { %1145 = vmatprep.subr.bf16.mxu1 %v1212_v62  ;;  %v691_v62 = vld [vmem:[#allocation2 + $0x660] sm:$0xff] }
 0x29d   :  { %v1146_v22 = vpack.c.bf16 %v692_v21, %v691_v62 }
 0x29f   :  { %1147 = vmatpush3.bf16.msra.mxu1 %v1146_v22 }
 0x355   :  { %v560_v26 = vpop.f32.mrb[2].mxu1 }
 0x356   :  { %v561_v28 = vadd.f32 %v560_v26, %v490_v25  ;;  %v901_v29 = vpop.f32.mrb[3].mxu1 }
 0x357   :  { %v695_v29 = vsub.s32 6, %v1277_v42 }
 0x358   :  { %v565_v30 = vadd.f32 %v564_v27, %v561_v28 }
 0x35a   :  { %v567_v31 = vsel %vm566_vm3, %v565_v30, 0.0 }
 0x35b   :  { %568 = vadd.xlane.f32.xlu1 %v567_v31 }
 0x3e8   :  { %v569_v32 = vpop.xlane.xlu1 %568 }
 0x3e9   :  { %v571_v33 = vmul.f32 0.015625, %v569_v32 }
 0x3eb   :  { %v1307_v34 = vsub.f32 %v565_v30, %v571_v33  ;;  %v696_v30 = vrot.slane %v1282_v48, %v695_v29 }
 0x3ed   :  { %v573_v35 = vmul.f32 %v1307_v34, %v1307_v34 }
 0x3ef   :  { %v574_v36 = vsel %vm566_vm3, %v573_v35, 0.0 }
 0x3f0   :  { %575 = vadd.xlane.f32.xlu1 %v574_v36 }
 0x47d   :  { %v576_v10 = vpop.xlane.xlu1 %575 }
 0x47e   :  { %v577_v11 = vmul.f32 0.015625, %v576_v10 }
 0x480   :  { %v578_v12 = vadd.f32 1e-05, %v577_v11 }
 0x482   :  { %1156 = vrsqrt.f32 %v578_v12 }
 0x48c   :  { %v1157_v16 = vpop.eup %1156 }
 0x48d   :  { %v580_v17 = vmul.f32 %v1157_v16, %v1307_v34 }
 0x48f   :  { %v585_v19 = vmul.f32 %v584_v15, %v580_v17 }
 0x491   :  { %v590_v20 = vadd.f32 %v589_v18, %v585_v19 }
 0x493   :  { %919 = vmatmul.mubr.msk.f32.vlgmr.msra.gmra.mrb[6].mxu0 %vm48_vm0, %v590_v20 }
 0x566   :  { %v672_v25 = vpop.f32.mrb[6].mxu0 }
 0x567   :  { %v673_v26 = vadd.f32 %v672_v25, %v602_v24  ;;  %v920_v27 = vpop.f32.mrb[7].mxu0 }
 0x569   :  { %v676_v28 = vmax.f32 %v673_v26, 0.0 }
 0x56b   :  { %954 = vmatmul.mubr.f32.vlgmr.msra.gmra.mrb[4].mxu1 %v676_v28 }
 0x63e   :  { %v763_v31 = vpop.f32.mrb[4].mxu1 }
 0x63f   :  { %v764_v32 = vadd.f32 %v763_v31, %v696_v30  ;;  %v955_v33 = vpop.f32.mrb[5].mxu1 }
 0x641   :  { %v767_v34 = vadd.f32 %v764_v32, %v590_v20 }
 0x643   :  { %v768_v35 = vsel %vm566_vm3, %v767_v34, 0.0 }
 0x644   :  { %769 = vadd.xlane.f32.xlu0 %v768_v35 }
 0x6d1   :  { %v770_v36 = vpop.xlane.xlu0 %769 }
 0x6d2   :  { %v771_v37 = vmul.f32 0.015625, %v770_v36 }
 0x6d4   :  { %v772_v38 = vsub.f32 %v767_v34, %v771_v37 }
 0x6d6   :  { %v773_v39 = vmul.f32 %v772_v38, %v772_v38 }
 0x6d8   :  { %v774_v40 = vsel %vm566_vm3, %v773_v39, 0.0 }
 0x6d9   :  { %775 = vadd.xlane.f32.xlu1 %v774_v40 }
 0x766   :  { %v776_v41 = vpop.xlane.xlu1 %775 }
 0x767   :  { %v777_v44 = vmul.f32 0.015625, %v776_v41 }
 0x769   :  { %v778_v45 = vadd.f32 1e-05, %v777_v44 }
 0x76b   :  { %1158 = vrsqrt.f32 %v778_v45 }
 0x775   :  { %v1159_v51 = vpop.eup %1158 }
 0x776   :  { %v780_v43 = vmul.f32 %v1159_v51, %v772_v38 }
 0x778   :  { %v785_v53 = vmul.f32 %v784_v50, %v780_v43 }
 0x77a   :  { %v790_v54 = vadd.f32 %v789_v52, %v785_v53 }
 0x77c   :  { %791 = vst.msk [vmem:[#allocation5] sm:$0x3] %vm566_vm3, %v790_v54 }
 0x77d   :  { %1193 = shalt.err (!%p1190_p12)
}
 0x77e   :  { %s1194_s17 = scalar_lea.hbm %s1354_s4, 32 }
 0x77f   :  { %p1195_p13 = scmp.ne.s32.totalorder %s1354_s4, %s1194_s17  ;;  %p1198_p0 = scmp.lt.u32.totalorder %s1194_s17, %s1354_s4 }
 0x781   :  { %p1200_p1 = pnand %p1198_p0, %p1195_p13 }
 0x783   :  { %1203 = shalt.err (!%p1200_p1)
}
 0x784   :  { %801 = dma.vmem_to_hbm [thread:$0]  %s799_s13, 32, %s1354_s4, [#allocation4]  }
 0x785   :  { %1206 = dma.done.wait [#allocation4], 32  }
 0x786   :  { %1207 = vsyncadd [#allocation4], 4294967264 }
 0x787   :  { %805 = vsyncpa [#allocation3], 1 }
 0x788   :  { %806 = vsyncpa [#allocation4], 1 }

</bundles_post_ra>
